<compile_context>
chip_gen: v7x
topology: tpu7x:2x2x1
jax: 0.10.0
libtpu: 0.0.40
codegen_flags: <defaults>
</compile_context>

<pallas_src>
import jax
import jax.numpy as jnp
from jax.experimental import pallas as pl
from jax.experimental.pallas import tpu as pltpu


def _round_up(x, m):
    return (x + m - 1) // m * m


def _epilogue(tb, n_pad):
    """sigmoid + round + per-block squared-error partial sums.

    Squared errors are computed per 8-row (sublane) chunk so no full-tile
    d / sq temporaries are materialized, and the chunk sums are combined with
    a pairwise tree (depth ~log2(tb/8)) instead of a serial add chain.
    """
    del n_pad  # shapes are implied by the refs

    def epi(logits, t_ref, pred_ref, round_ref, part_ref):
        # Exact sigmoid via tanh: one EUP op, leaves the VPU for the epilogue.
        p = 0.5 * jnp.tanh(0.5 * logits) + 0.5
        pred_ref[...] = p.astype(pred_ref.dtype)
        # jnp.round is half-to-even, matching torch.round; values are 0/1 -> int8.
        round_ref[...] = jnp.round(p).astype(round_ref.dtype)

        chunks = []
        for r in range(tb // 8):
            d = p[8 * r:8 * (r + 1), :] - t_ref[8 * r:8 * (r + 1), :]
            chunks.append(d * d)
        while len(chunks) > 1:
            nxt = [a + b for a, b in zip(chunks[0::2], chunks[1::2])]
            if len(chunks) & 1:
                nxt.append(chunks[-1])
            chunks = nxt
        part_ref[...] = chunks[0]

    return epi


def _make_single_k_kernel(tb, n_pad):
    epi = _epilogue(tb, n_pad)

    def kernel(x_ref, w_ref, b_ref, t_ref, pred_ref, round_ref, part_ref):
        logits = jnp.dot(x_ref[...], w_ref[...],
                         preferred_element_type=jnp.float32) + b_ref[...]
        epi(logits, t_ref, pred_ref, round_ref, part_ref)

    return kernel


def _make_k_tiled_kernel(tb, n_pad):
    epi = _epilogue(tb, n_pad)

    def kernel(x_ref, w_ref, b_ref, t_ref, pred_ref, round_ref, part_ref, acc_ref):
        k = pl.program_id(1)

        @pl.when(k == 0)
        def _():
            acc_ref[...] = jnp.zeros_like(acc_ref)

        acc_ref[...] += jnp.dot(x_ref[...], w_ref[...],
                                preferred_element_type=jnp.float32)

        @pl.when(k == pl.num_programs(1) - 1)
        def _():
            epi(acc_ref[...] + b_ref[...], t_ref, pred_ref, round_ref, part_ref)

    return kernel


def shared_mse_linear(feature, weight, bias, target, *, tb=None, k_tile=None,
                      matmul_dtype=jnp.float32):
    """feature [B, in_dim], weight [nclass, in_dim], bias [nclass],
    target [B, nclass].  Returns dict(pred, output, loss) matching the
    eval-mode PyTorch forward.  `k_tile` (multiple of 128) forces the
    K-tiled path; `matmul_dtype=jnp.bfloat16` trades accuracy for MXU speed."""
    B, in_dim = feature.shape
    nclass = weight.shape[0]
    f32 = jnp.float32
    n_pad = _round_up(nclass, 128)                 # lane-dense output width

    # --- generation-aware VMEM caps (v7x: 64 MiB/TC, v5e/v6e: 128 MiB) -------
    try:
        vmem_cap = int(pltpu.get_tpu_info().vmem_capacity_bytes)
    except Exception:
        vmem_cap = 64 * 2**20                      # conservative (v7x) fallback
    budget = min(48 * 2**20, int(vmem_cap * 0.4))  # tiling budget
    vmem_limit_cap = max(32 * 2**20, vmem_cap - 16 * 2**20)

    in_bytes = jnp.dtype(matmul_dtype).itemsize

    # --- K (in_dim) tiling: only when the resident W^T would blow the budget -
    K = in_dim
    if k_tile is not None:
        tk = min(int(k_tile), K)
    elif K * n_pad * in_bytes <= budget // 3:
        tk = K                                     # whole W^T stays resident
    else:
        tk = max(128, ((budget // 3) // (2 * n_pad * in_bytes)) // 128 * 128)
    if tk >= K:
        # Resident-weight path.  Lane-align the contraction dim for large,
        # non-128-multiple in_dim (skip for small in_dim: wasted K work).
        K_pad = _round_up(K, 128) if (K > 128 and K % 128 != 0) else K
        tk = K_pad
    else:
        K_pad = _round_up(K, tk)
    num_k = K_pad // tk

    # --- batch tile: biggest multiple of 8 that fits the remaining budget ----
    # fixed: weight + bias buffers; per-row: x (2 bufs) + target (2) + pred f32
    # out (2) + round int8 out (2) + K accumulator + ~2 full-width f32 temps.
    fixed = 2 * tk * n_pad * in_bytes + 2 * n_pad * 4
    per_row = (2 * tk * in_bytes) + (2 * n_pad * 4) + (2 * n_pad * 4) \
        + (2 * n_pad * 1) + (n_pad * 4 if num_k > 1 else 0) + (2 * n_pad * 4)
    if tb is None:
        max_rows = max(8, (budget - fixed) // per_row)
        tb = max(8, min(1024, _round_up(B, 8), (max_rows // 8) * 8))
        if B >= 16:
            # v7x has 2 TensorCores: keep >=2 steps on the "parallel" batch
            # axis so both get work (harmless extra step on v5e/v6e).
            tb = min(tb, max(8, _round_up((B + 1) // 2, 8)))
    B_pad = _round_up(B, tb)
    num_blocks = B_pad // tb

    vmem_est = fixed + tb * per_row + 2 * 8 * n_pad * 4
    vmem_limit = int(min(vmem_limit_cap, max(32 * 2**20, 2 * vmem_est)))

    # --- operand prep: in-kernel masking replaced by numerically-inert padding
    x = feature.astype(f32)
    if K_pad != K:
        x = jnp.pad(x, ((0, 0), (0, K_pad - K)))
    if B_pad != B:
        x = jnp.pad(x, ((0, B_pad - B), (0, 0)))   # zero rows -> logits = bias
    w_t = jnp.pad(weight.astype(f32).T, ((0, K_pad - K), (0, n_pad - nclass)))
    # Padded class lanes get bias = -1e4: sigmoid is exactly 0.0 in f32, so with
    # a zero target they add exactly 0 loss and need no column mask.
    b2 = jnp.pad(bias.astype(f32).reshape(1, nclass),
                 ((0, 0), (0, n_pad - nclass)), constant_values=-1e4)
    t = jnp.pad(target.astype(f32), ((0, 0), (0, n_pad - nclass)))
    if B_pad != B:
        # Padded batch rows see logits == bias; give them target = sigmoid(bias)
        # (same tanh formulation) so their loss contribution is ~0 (ULP^2).
        row_fill = 0.5 * jnp.tanh(0.5 * b2) + 0.5
        t = jnp.concatenate(
            [t, jnp.broadcast_to(row_fill, (B_pad - B, n_pad))], axis=0)
    x = x.astype(matmul_dtype)
    w_t = w_t.astype(matmul_dtype)

    out_shapes = (
        jax.ShapeDtypeStruct((B_pad, n_pad), f32),            # pred (sigmoid)
        jax.ShapeDtypeStruct((B_pad, n_pad), jnp.int8),       # rounded (0/1)
        jax.ShapeDtypeStruct((num_blocks * 8, n_pad), f32),   # loss partials
    )

    def build(single_buffer_resident):
        def spec(shape, index_map, resident=False):
            kwargs = {}
            if resident and single_buffer_resident:
                # Constant index_map -> no need to double-buffer; halves the
                # resident weight VMEM (matters most under v7x's 64 MiB).
                kwargs["pipeline_mode"] = pl.Buffered(1)
            return pl.BlockSpec(shape, index_map, **kwargs)

        if num_k == 1:
            kernel = _make_single_k_kernel(tb, n_pad)
            grid = (num_blocks,)
            in_specs = [
                spec((tb, K_pad), lambda i: (i, 0)),                     # x
                spec((K_pad, n_pad), lambda i: (0, 0), resident=True),   # W^T
                spec((1, n_pad), lambda i: (0, 0), resident=True),       # bias
                spec((tb, n_pad), lambda i: (i, 0)),                     # target
            ]
            out_specs = [
                pl.BlockSpec((tb, n_pad), lambda i: (i, 0)),
                pl.BlockSpec((tb, n_pad), lambda i: (i, 0)),
                pl.BlockSpec((8, n_pad), lambda i: (i, 0)),
            ]
            scratch = []
            semantics = ("parallel",)
        else:
            kernel = _make_k_tiled_kernel(tb, n_pad)
            grid = (num_blocks, num_k)
            in_specs = [
                spec((tb, tk), lambda i, k: (i, k)),                     # x
                spec((tk, n_pad), lambda i, k: (k, 0)),                  # W^T
                spec((1, n_pad), lambda i, k: (0, 0), resident=True),    # bias
                spec((tb, n_pad), lambda i, k: (i, 0)),                  # target
            ]
            out_specs = [
                pl.BlockSpec((tb, n_pad), lambda i, k: (i, 0)),
                pl.BlockSpec((tb, n_pad), lambda i, k: (i, 0)),
                pl.BlockSpec((8, n_pad), lambda i, k: (i, 0)),
            ]
            scratch = [pltpu.VMEM((tb, n_pad), f32)]
            semantics = ("parallel", "arbitrary")

        return pl.pallas_call(
            kernel,
            out_shape=out_shapes,
            grid_spec=pltpu.PrefetchScalarGridSpec(
                num_scalar_prefetch=0,
                grid=grid,
                in_specs=in_specs,
                out_specs=out_specs,
                scratch_shapes=scratch,
            ),
            compiler_params=pltpu.CompilerParams(
                dimension_semantics=semantics,
                vmem_limit_bytes=vmem_limit),
        )

    outs, last_err = None, None
    for hint in (True, False):      # graceful fallback if pipeline_mode=Buffered(1)
        try:                        # is not supported by the installed Pallas
            outs = jax.block_until_ready(build(hint)(x, w_t, b2, t))
            break
        except Exception as err:    # pragma: no cover - version dependent
            last_err = err
    if outs is None:
        raise last_err
    pred_full, round_full, partials = outs

    pred = pred_full[:B, :nclass]
    rounded = round_full[:B, :nclass].astype(f32)
    loss = jnp.sum(partials) / jnp.float32(B * nclass)        # nn.MSELoss 'mean'
    return {"pred": pred, "output": rounded, "loss": loss}


if __name__ == "__main__":
    key = jax.random.PRNGKey(0)

    def run_case(B, in_dim, nclass, case_key, **kw):
        k_x, k_w, k_b, k_t = jax.random.split(case_key, 4)
        feature = jax.random.normal(k_x, (B, in_dim), dtype=jnp.float32)
        # nn.Linear-shaped params: weight [nclass, in_dim], bias [nclass].
        bound = 1.0 / jnp.sqrt(jnp.float32(in_dim))
        weight = jax.random.uniform(k_w, (nclass, in_dim), jnp.float32, -bound, bound)
        bias = jax.random.uniform(k_b, (nclass,), jnp.float32, -bound, bound)
        target = jax.random.bernoulli(k_t, 0.5, (B, nclass)).astype(jnp.float32)

        preds = shared_mse_linear(feature, weight, bias, target, **kw)
        jax.block_until_ready(preds)

        # Reference check in plain JAX.
        ref_pred = jax.nn.sigmoid(feature @ weight.T + bias)
        ref_loss = jnp.mean((ref_pred - target) ** 2)
        assert preds["pred"].shape == (B, nclass)
        assert jnp.allclose(preds["pred"], ref_pred, atol=1e-5)
        assert jnp.allclose(preds["output"], jnp.round(ref_pred), atol=1e-5)
        assert jnp.allclose(preds["loss"], ref_loss, atol=1e-5)

    k1, k2 = jax.random.split(key)
    # Default (resident-weight) path; B=16 also exercises the >=2 grid steps rule.
    run_case(16, 32, 16, k1)
    # Force the K-tiled fallback path (2 contraction steps) + padded batch rows.
    run_case(13, 256, 16, k2, k_tile=128)

    print("KERNEL_OK")
</pallas_src>

<mosaic_0001>
module attributes {stable_mosaic.version = 11 : i64} {
  func.func @kernel(%arg0: i32, %arg1: memref<8x32xf32, #tpu.memory_space<vmem>>, %arg2: memref<32x128xf32, #tpu.memory_space<vmem>>, %arg3: memref<1x128xf32, #tpu.memory_space<vmem>>, %arg4: memref<8x128xf32, #tpu.memory_space<vmem>>, %arg5: memref<8x128xf32, #tpu.memory_space<vmem>>, %arg6: memref<8x128xi8, #tpu.memory_space<vmem>>, %arg7: memref<8x128xf32, #tpu.memory_space<vmem>>) attributes {dimension_semantics = [#tpu.dimension_semantics<parallel>], iteration_bounds = array<i64: 2>, scalar_prefetch = 0 : i64, scratch_operands = 0 : i64, tpu.core_type = #tpu.core_type<tc>, window_params = [{transform_indices = @transform_0, window_bounds = array<i64: 8, 32>}, {pipeline_mode = #tpu.pipeline_mode<synchronous>, transform_indices = @transform_1, window_bounds = array<i64: 32, 128>}, {pipeline_mode = #tpu.pipeline_mode<synchronous>, transform_indices = @transform_2, window_bounds = array<i64: 1, 128>}, {transform_indices = @transform_3, window_bounds = array<i64: 8, 128>}, {transform_indices = @transform_4, window_bounds = array<i64: 8, 128>}, {transform_indices = @transform_5, window_bounds = array<i64: 8, 128>}, {transform_indices = @transform_6, window_bounds = array<i64: 8, 128>}]} {
    %c0 = arith.constant 0 : index
    %c0_0 = arith.constant 0 : index
    %0 = vector.load %arg1[%c0, %c0_0] : memref<8x32xf32, #tpu.memory_space<vmem>>, vector<8x32xf32>
    %c0_1 = arith.constant 0 : index
    %c0_2 = arith.constant 0 : index
    %1 = vector.load %arg2[%c0_1, %c0_2] : memref<32x128xf32, #tpu.memory_space<vmem>>, vector<32x128xf32>
    %cst = arith.constant dense<0.000000e+00> : vector<8x128xf32>
    %2 = tpu.matmul %0, %1, %cst {dimension_numbers = #tpu.dot_dimension_numbers<[1], [0], [0], [1], [0, 0, 1, 1], [], []>} : vector<8x32xf32>, vector<32x128xf32>, vector<8x128xf32> -> vector<8x128xf32>
    %c0_3 = arith.constant 0 : index
    %c0_4 = arith.constant 0 : index
    %3 = vector.load %arg3[%c0_3, %c0_4] : memref<1x128xf32, #tpu.memory_space<vmem>>, vector<1x128xf32>
    %4 = vector.broadcast %3 : vector<1x128xf32> to vector<8x128xf32>
    %5 = arith.addf %2, %4 : vector<8x128xf32>
    %cst_5 = arith.constant 5.000000e-01 : f32
    %6 = vector.broadcast %cst_5 : f32 to vector<8x128xf32>
    %7 = arith.mulf %6, %5 : vector<8x128xf32>
    %8 = math.tanh %7 : vector<8x128xf32>
    %cst_6 = arith.constant 5.000000e-01 : f32
    %9 = vector.broadcast %cst_6 : f32 to vector<8x128xf32>
    %10 = arith.mulf %9, %8 : vector<8x128xf32>
    %cst_7 = arith.constant 5.000000e-01 : f32
    %11 = vector.broadcast %cst_7 : f32 to vector<8x128xf32>
    %12 = arith.addf %10, %11 : vector<8x128xf32>
    %c0_8 = arith.constant 0 : index
    %c0_9 = arith.constant 0 : index
    %13 = vector.load %arg5[%c0_8, %c0_9] : memref<8x128xf32, #tpu.memory_space<vmem>>, vector<8x128xf32>
    tpu.vector_store %arg5[%c0_8, %c0_9], %12 {strides = array<i32>} : memref<8x128xf32, #tpu.memory_space<vmem>>, vector<8x128xf32>,
    %14 = math.roundeven %12 : vector<8x128xf32>
    %15 = arith.fptosi %14 : vector<8x128xf32> to vector<8x128xi8>
    %c0_10 = arith.constant 0 : index
    %c0_11 = arith.constant 0 : index
    %16 = vector.load %arg6[%c0_10, %c0_11] : memref<8x128xi8, #tpu.memory_space<vmem>>, vector<8x128xi8>
    tpu.vector_store %arg6[%c0_10, %c0_11], %15 {strides = array<i32>} : memref<8x128xi8, #tpu.memory_space<vmem>>, vector<8x128xi8>,
    %c0_12 = arith.constant 0 : index
    %c0_13 = arith.constant 0 : index
    %17 = vector.load %arg4[%c0_12, %c0_13] : memref<8x128xf32, #tpu.memory_space<vmem>>, vector<8x128xf32>
    %18 = arith.subf %12, %17 : vector<8x128xf32>
    %19 = arith.mulf %18, %18 : vector<8x128xf32>
    %c0_14 = arith.constant 0 : index
    %c0_15 = arith.constant 0 : index
    %20 = vector.load %arg7[%c0_14, %c0_15] : memref<8x128xf32, #tpu.memory_space<vmem>>, vector<8x128xf32>
    tpu.vector_store %arg7[%c0_14, %c0_15], %19 {strides = array<i32>} : memref<8x128xf32, #tpu.memory_space<vmem>>, vector<8x128xf32>,
    return
  }
  func.func @transform_0(%arg0: i32) -> (i32, i32) {
    %c0_i32 = arith.constant 0 : i32
    %c0_i32_0 = arith.constant 0 : i32
    return %arg0, %c0_i32 : i32, i32
  }
  func.func @transform_1(%arg0: i32) -> (i32, i32) {
    %c0_i32 = arith.constant 0 : i32
    %c0_i32_0 = arith.constant 0 : i32
    %c0_i32_1 = arith.constant 0 : i32
    return %c0_i32, %c0_i32_0 : i32, i32
  }
  func.func @transform_2(%arg0: i32) -> (i32, i32) {
    %c0_i32 = arith.constant 0 : i32
    %c0_i32_0 = arith.constant 0 : i32
    %c0_i32_1 = arith.constant 0 : i32
    return %c0_i32, %c0_i32_0 : i32, i32
  }
  func.func @transform_3(%arg0: i32) -> (i32, i32) {
    %c0_i32 = arith.constant 0 : i32
    %c0_i32_0 = arith.constant 0 : i32
    return %arg0, %c0_i32 : i32, i32
  }
  func.func @transform_4(%arg0: i32) -> (i32, i32) {
    %c0_i32 = arith.constant 0 : i32
    %c0_i32_0 = arith.constant 0 : i32
    return %arg0, %c0_i32 : i32, i32
  }
  func.func @transform_5(%arg0: i32) -> (i32, i32) {
    %c0_i32 = arith.constant 0 : i32
    %c0_i32_0 = arith.constant 0 : i32
    return %arg0, %c0_i32 : i32, i32
  }
  func.func @transform_6(%arg0: i32) -> (i32, i32) {
    %c0_i32 = arith.constant 0 : i32
    %c0_i32_0 = arith.constant 0 : i32
    return %arg0, %c0_i32 : i32, i32
  }
}

module attributes {stable_mosaic.version = 11 : i64} {
  func.func @kernel(%arg0: i32, %arg1: memref<8x32xf32, #tpu.memory_space<vmem>>, %arg2: memref<32x128xf32, #tpu.memory_space<vmem>>, %arg3: memref<1x128xf32, #tpu.memory_space<vmem>>, %arg4: memref<8x128xf32, #tpu.memory_space<vmem>>, %arg5: memref<8x128xf32, #tpu.memory_space<vmem>>, %arg6: memref<8x128xi8, #tpu.memory_space<vmem>>, %arg7: memref<8x128xf32, #tpu.memory_space<vmem>>) attributes {dimension_semantics = [#tpu.dimension_semantics<parallel>], iteration_bounds = array<i64: 2>, scalar_prefetch = 0 : i64, scratch_operands = 0 : i64, tpu.core_type = #tpu.core_type<tc>, window_params = [{transform_indices = @transform_0, window_bounds = array<i64: 8, 32>}, {pipeline_mode = #tpu.pipeline_mode<synchronous>, transform_indices = @transform_1, window_bounds = array<i64: 32, 128>}, {pipeline_mode = #tpu.pipeline_mode<synchronous>, transform_indices = @transform_2, window_bounds = array<i64: 1, 128>}, {transform_indices = @transform_3, window_bounds = array<i64: 8, 128>}, {transform_indices = @transform_4, window_bounds = array<i64: 8, 128>}, {transform_indices = @transform_5, window_bounds = array<i64: 8, 128>}, {transform_indices = @transform_6, window_bounds = array<i64: 8, 128>}]} {
    %c0 = arith.constant 0 : index
    %c0_0 = arith.constant 0 : index
    %0 = vector.load %arg1[%c0, %c0_0] : memref<8x32xf32, #tpu.memory_space<vmem>>, vector<8x32xf32>
    %c0_1 = arith.constant 0 : index
    %c0_2 = arith.constant 0 : index
    %1 = vector.load %arg2[%c0_1, %c0_2] : memref<32x128xf32, #tpu.memory_space<vmem>>, vector<32x128xf32>
    %cst = arith.constant dense<0.000000e+00> : vector<8x128xf32>
    %2 = tpu.matmul %0, %1, %cst {dimension_numbers = #tpu.dot_dimension_numbers<[1], [0], [0], [1], [0, 0, 1, 1], [], []>} : vector<8x32xf32>, vector<32x128xf32>, vector<8x128xf32> -> vector<8x128xf32>
    %c0_3 = arith.constant 0 : index
    %c0_4 = arith.constant 0 : index
    %3 = vector.load %arg3[%c0_3, %c0_4] : memref<1x128xf32, #tpu.memory_space<vmem>>, vector<1x128xf32>
    %4 = vector.broadcast %3 : vector<1x128xf32> to vector<8x128xf32>
    %5 = arith.addf %2, %4 : vector<8x128xf32>
    %cst_5 = arith.constant 5.000000e-01 : f32
    %6 = vector.broadcast %cst_5 : f32 to vector<8x128xf32>
    %7 = arith.mulf %6, %5 : vector<8x128xf32>
    %8 = math.tanh %7 : vector<8x128xf32>
    %cst_6 = arith.constant 5.000000e-01 : f32
    %9 = vector.broadcast %cst_6 : f32 to vector<8x128xf32>
    %10 = arith.mulf %9, %8 : vector<8x128xf32>
    %cst_7 = arith.constant 5.000000e-01 : f32
    %11 = vector.broadcast %cst_7 : f32 to vector<8x128xf32>
    %12 = arith.addf %10, %11 : vector<8x128xf32>
    %c0_8 = arith.constant 0 : index
    %c0_9 = arith.constant 0 : index
    %13 = vector.load %arg5[%c0_8, %c0_9] : memref<8x128xf32, #tpu.memory_space<vmem>>, vector<8x128xf32>
    tpu.vector_store %arg5[%c0_8, %c0_9], %12 {strides = array<i32>} : memref<8x128xf32, #tpu.memory_space<vmem>>, vector<8x128xf32>,
    %14 = math.roundeven %12 : vector<8x128xf32>
    %15 = arith.fptosi %14 : vector<8x128xf32> to vector<8x128xi8>
    %c0_10 = arith.constant 0 : index
    %c0_11 = arith.constant 0 : index
    %16 = vector.load %arg6[%c0_10, %c0_11] : memref<8x128xi8, #tpu.memory_space<vmem>>, vector<8x128xi8>
    tpu.vector_store %arg6[%c0_10, %c0_11], %15 {strides = array<i32>} : memref<8x128xi8, #tpu.memory_space<vmem>>, vector<8x128xi8>,
    %c0_12 = arith.constant 0 : index
    %c0_13 = arith.constant 0 : index
    %17 = vector.load %arg4[%c0_12, %c0_13] : memref<8x128xf32, #tpu.memory_space<vmem>>, vector<8x128xf32>
    %18 = arith.subf %12, %17 : vector<8x128xf32>
    %19 = arith.mulf %18, %18 : vector<8x128xf32>
    %c0_14 = arith.constant 0 : index
    %c0_15 = arith.constant 0 : index
    %20 = vector.load %arg7[%c0_14, %c0_15] : memref<8x128xf32, #tpu.memory_space<vmem>>, vector<8x128xf32>
    tpu.vector_store %arg7[%c0_14, %c0_15], %19 {strides = array<i32>} : memref<8x128xf32, #tpu.memory_space<vmem>>, vector<8x128xf32>,
    return
  }
  func.func @transform_0(%arg0: i32) -> (i32, i32) {
    %c0_i32 = arith.constant 0 : i32
    %c0_i32_0 = arith.constant 0 : i32
    return %arg0, %c0_i32 : i32, i32
  }
  func.func @transform_1(%arg0: i32) -> (i32, i32) {
    %c0_i32 = arith.constant 0 : i32
    %c0_i32_0 = arith.constant 0 : i32
    %c0_i32_1 = arith.constant 0 : i32
    return %c0_i32, %c0_i32_0 : i32, i32
  }
  func.func @transform_2(%arg0: i32) -> (i32, i32) {
    %c0_i32 = arith.constant 0 : i32
    %c0_i32_0 = arith.constant 0 : i32
    %c0_i32_1 = arith.constant 0 : i32
    return %c0_i32, %c0_i32_0 : i32, i32
  }
  func.func @transform_3(%arg0: i32) -> (i32, i32) {
    %c0_i32 = arith.constant 0 : i32
    %c0_i32_0 = arith.constant 0 : i32
    return %arg0, %c0_i32 : i32, i32
  }
  func.func @transform_4(%arg0: i32) -> (i32, i32) {
    %c0_i32 = arith.constant 0 : i32
    %c0_i32_0 = arith.constant 0 : i32
    return %arg0, %c0_i32 : i32, i32
  }
  func.func @transform_5(%arg0: i32) -> (i32, i32) {
    %c0_i32 = arith.constant 0 : i32
    %c0_i32_0 = arith.constant 0 : i32
    return %arg0, %c0_i32 : i32, i32
  }
  func.func @transform_6(%arg0: i32) -> (i32, i32) {
    %c0_i32 = arith.constant 0 : i32
    %c0_i32_0 = arith.constant 0 : i32
    return %arg0, %c0_i32 : i32, i32
  }
}

</mosaic_0001>

<bundles_post_ra>
// kernel: tpu_custom_call.1
= control target key start
LH: loop header
LB: loop body
LE: loop exit
PB: predicated region body
PF: predicated region fallthrough
CT: control target
= control target key end

     0   :  { %s1384_s0 = inlined_call_operand.hbm [shape: f32[16,32], index: 0, kind: input, shape index: {}]   ;;  %s1385_s1 = inlined_call_operand.hbm [shape: f32[32,128], index: 1, kind: input, shape index: {}]   ;;  %s1386_s2 = inlined_call_operand.vmem [shape: f32[1,128], index: 2, kind: input, shape index: {}]   ;;  %s1387_s3 = inlined_call_operand.hbm [shape: f32[16,128], index: 3, kind: input, shape index: {}]   ;;  %s1388_s4 = inlined_call_operand.hbm [shape: f32[16,128], index: 4, kind: output, shape index: {0}]   ;;  %s1389_s5 = inlined_call_operand.hbm [shape: s8[16,128], index: 5, kind: output, shape index: {1}]   ;;  %s1390_s6 = inlined_call_operand.hbm [shape: f32[16,128], index: 6, kind: output, shape index: {2}]  }
   0x1   :  { %1399 = sst [smem:[#allocation17_spill]] %s1384_s0 }
   0x2   :  { %1400 = sst [smem:[#allocation18_spill]] %s1387_s3 }
   0x3   :  { %12 = vsyncpa [#allocation3], 0 }
   0x4   :  { %14 = vsyncpa [#allocation3 + $0x1], 0 }
   0x5   :  { %15 = vsyncpa [#allocation6], 0 }
   0x6   :  { %16 = vsyncpa [#allocation4], 0 }
   0x7   :  { %18 = vsyncpa [#allocation4 + $0x1], 0 }
   0x8   :  { %19 = vsyncpa [#allocation10], 0 }
   0x9   :  { %21 = vsyncpa [#allocation10 + $0x1], 0  ;;  %s1043_s21 = smov 0   ;;  %s1045_s22 = smov 0  }
   0xa   :  { %s1047_s23 = smov 0   ;;  %s1049_s24 = smov 0  }
   0xb LB: > { %s1064_s25 = sadd.s32 1, %s995_s24   ;;  %s34_s26 = sadd.s32 1, %s991_s23  ;;  %s995_s24 = sphi %s1049_s24, %s1423_s24   ;;  %s991_s23 = sphi %s1047_s23, %s1422_s23   ;;  %s987_s22 = sphi %s1045_s22, %s1421_s22   ;;  %s983_s21 = sphi %s1043_s21, %s1420_s21  }
   0xc   : > { %s31_s27 = ssub.s32 %s995_s24, %s1064_s25  ;;  %p41_p0 = scmp.ne.s32.totalorder %s991_s23, %s987_s22 }
   0xd   : > { %p32_p1 = scmp.eq.s32.totalorder %s31_s27, 0  ;;  %p42_p2 = scmp.eq.s32.totalorder %s995_s24, 0 }
   0xe   : > { %p730_p4 = scmp.lt.s32.totalorder %s995_s24, 2  ;;  %s233_s29 = sand.u32 1, %s995_s24  }
   0xf   : > { %s1075_s28 = scalar_select %p32_p1, %s991_s23, %s34_s26  }
  0x10   : > { %p43_p5 = por %p42_p2, %p41_p0  ;;  %s235_s30 = sand.u32 1, %s991_s23  }
  0x11   : > { %s1082_s7 = sshll.u32 %s235_s30, 3  ;;  %s652_s8 = sshll.u32 %s995_s24, 7 }
  0x12   : > { %s1401_s0 = sld [smem:[#allocation17_spill]]  ;;  %s237_s12 = scalar_lea.vmem [#allocation2], %s1082_s7 }
  0x13   : > { %s244_s13 = sshll.u32 %s237_s12, 4  ;;  %p1093_p6 = pnand %p730_p4, %p43_p5  ;;  %s1097_s13 = int_to_ptr.vmem [resolvable:$true] %s244_s13 }
  0x14   : > { %s1099_s15 = scalar_lea.sflag [#allocation3], %s233_s29 }
  0x15   : > { %p775_p8 = pneg %p1093_p6 }
  0x18   : > { %s1090_s11 = scalar_lea.hbm %s1401_s0, %s652_s8  ;;  %s778_s19 = scalar_lea.hbm %s1401_s0, 256 }
  0x19   : > { %s773_s16 = scalar_lea.hbm %s1090_s11, 128  ;;  %p779_p11 = scmp.lt.u32.totalorder %s1090_s11, %s1401_s0 }
  0x1a   : > { %p774_p7 = scmp.ne.s32.totalorder %s1090_s11, %s773_s16  ;;  %p780_p12 = scmp.lt.u32.totalorder %s778_s19, %s773_s16 }
  0x1b   : > { %p782_p1 = scmp.lt.u32.totalorder %s773_s16, %s1090_s11 }
  0x1c   : > { %p776_p9 = pnand %p775_p8, %p774_p7  ;;  %p781_p13 = por %p780_p12, %p779_p11 }
  0x1e   : > { %p777_p10 = pneg %p776_p9  ;;  %p783_p2 = por %p782_p1, %p781_p13 }
  0x20   : > { %p784_p4 = pnand %p783_p2, %p777_p10 }
  0x22   : > { %787 = shalt.err (!%p784_p4)
}
  0x23   : > { %s788_s27 = scalar_lea.vmem %s1097_s13, 128  ;;  %s997_s29 = smov [#allocation2]  }
  0x24   : > { %p789_p5 = scmp.ne.s32.totalorder %s1097_s13, %s788_s27  ;;  %s793_s30 = sshll.u32 %s997_s29, 4  ;;  %s794_s30 = int_to_ptr.vmem [resolvable:$false] %s793_s30 }
  0x25   : > { %s795_s9 = scalar_lea.vmem %s794_s30, 256  ;;  %p796_p3 = scmp.lt.s32.totalorder %s1097_s13, %s794_s30 }
  0x26   : > { %p791_p7 = pnand %p789_p5, %p775_p8  ;;  %p797_p11 = scmp.lt.s32.totalorder %s795_s9, %s788_s27 }
  0x28   : > { %p792_p9 = pneg %p791_p7  ;;  %p798_p12 = por %p797_p11, %p796_p3 }
  0x2a   : > { %p799_p13 = pnand %p798_p12, %p792_p9 }
  0x2c   : > { %802 = shalt.err (!%p799_p13)
}
  0x2d   : > { %715 = dma.hbm_to_vmem [thread:$0]  (!%p1093_p6), %s1090_s11, 128, %s1097_s13, %s1099_s15  }
  0x2e   : > { %s1128_s10 = sadd.s32 4294967295, %s995_s24   ;;  %s1393_s12 = sadd.s32 4294967294, %s995_s24  }
  0x2f   : > { %p47_p3 = scmp.ne.s32.totalorder %s987_s22, %s983_s21  ;;  %p1391_p10 = scmp.eq.s32.totalorder %s1128_s10, 0 }
  0x30   : > { %p139_p1 = scmp.eq.s32.totalorder %s1128_s10, 1  ;;  %p145_p2 = scmp.eq.s32.totalorder %s1393_s12, 1 }
  0x31   : > { %p1139_p4 = por %p1391_p10, %p47_p3  ;;  %p648_p5 = scmp.ge.s32.totalorder %s995_s24, 1 }
  0x32   : > { %p1147_p7 = por %p139_p1, %p41_p0  ;;  %p1151_p9 = por %p145_p2, %p47_p3 }
  0x33   : > { %s1403_s16 = scalar_select %p1139_p4, 1, 0 }
  0x34   : > { %s1404_s11 = scalar_select %p1147_p7, 1, 0 }
  0x35   : > { %s1405_s13 = scalar_select %p1151_p9, 1, 0 }
  0x36   : > { %p204_p11 = scmp.lt.s32.totalorder %s995_s24, 3  ;;  %s998_s18 = smov [#allocation5]  }
  0x37   : > { %s216_s19 = sshll.u32 %s998_s18, 4  ;;  %s1407_s3 = sld [smem:[#allocation18_spill]]  ;;  %s1170_s19 = int_to_ptr.vmem [resolvable:$true] %s216_s19 }
  0x38   : > { %p1156_p12 = pnand %p648_p5, %p204_p11  ;;  %s255_s29 = scalar_lea.vmem [#allocation7], %s1082_s7 }
  0x39   : > { %s262_s30 = sshll.u32 %s255_s29, 4  ;;  %s263_s30 = int_to_ptr.vmem [resolvable:$true] %s262_s30 }
  0x3a   : > { %s1406_s17 = scalar_select %p1156_p12, 1, 0 }
  0x3b   : > { %p708_p0 = pneg %p1156_p12 }
  0x3d   : > { %s1165_s27 = scalar_lea.hbm %s1407_s3, %s652_s8  ;;  %p1174_p13 = pnand %p708_p0, %p1391_p10 }
  0x3e   : > { %s803_s18 = scalar_lea.hbm %s1165_s27, 128  ;;  %s808_s26 = scalar_lea.hbm %s1407_s3, 256 }
  0x3f   : > { %s1408_s9 = scalar_select %p1174_p13, 1, 0 }
  0x40   : > { %p804_p3 = scmp.ne.s32.totalorder %s1165_s27, %s803_s18  ;;  %p809_p5 = scmp.lt.u32.totalorder %s1165_s27, %s1407_s3 }
  0x41   : > { %p810_p11 = scmp.lt.u32.totalorder %s808_s26, %s803_s18  ;;  %p812_p0 = scmp.lt.u32.totalorder %s803_s18, %s1165_s27 }
  0x42   : > { %p806_p1 = pnand %p804_p3, %p775_p8 }
  0x43   : > { %p811_p9 = por %p810_p11, %p809_p5 }
  0x44   : > { %p807_p2 = pneg %p806_p1 }
  0x45   : > { %p813_p10 = por %p812_p0, %p811_p9 }
  0x47   : > { %p814_p7 = pnand %p813_p10, %p807_p2 }
  0x49   : > { %817 = shalt.err (!%p814_p7)
}
  0x4a   : > { %s818_s12 = scalar_lea.vmem %s263_s30, 128  ;;  %s999_s0 = smov [#allocation7]  }
  0x4b   : > { %p819_p4 = scmp.ne.s32.totalorder %s263_s30, %s818_s12  ;;  %s823_s8 = sshll.u32 %s999_s0, 4  ;;  %s824_s8 = int_to_ptr.vmem [resolvable:$false] %s823_s8 }
  0x4c   : > { %s825_s20 = scalar_lea.vmem %s824_s8, 256  ;;  %p826_p12 = scmp.lt.s32.totalorder %s263_s30, %s824_s8 }
  0x4d   : > { %p821_p3 = pnand %p819_p4, %p775_p8  ;;  %p827_p13 = scmp.lt.s32.totalorder %s825_s20, %s818_s12 }
  0x4f   : > { %p822_p1 = pneg %p821_p3  ;;  %p828_p5 = por %p827_p13, %p826_p12 }
  0x51   : > { %p829_p11 = pnand %p828_p5, %p822_p1 }
  0x53   : > { %832 = shalt.err (!%p829_p11)
}
  0x54   : > { %718 = dma.hbm_to_vmem [thread:$0]  (!%p1093_p6), %s1165_s27, 128, %s263_s30, %s1099_s15  }
  0x55   : > { %s833_s7 = scalar_lea.hbm %s1385_s1, 512  ;;  %p1409_p10 = scmp.ne.s32.totalorder %s1408_s9, 0 }
  0x56   : > { %p834_p8 = scmp.ne.s32.totalorder %s1385_s1, %s833_s7  ;;  %p840_p12 = scmp.lt.u32.totalorder %s833_s7, %s1385_s1 }
  0x57   : > { %p835_p4 = pneg %p1409_p10 }
  0x59   : > { %p836_p7 = pnand %p835_p4, %p834_p8 }
  0x5b   : > { %p837_p9 = pneg %p836_p7 }
  0x5d   : > { %p842_p13 = pnand %p840_p12, %p837_p9 }
  0x5f   : > { %845 = shalt.err (!%p842_p13)
}
  0x60   : > { %s846_s14 = scalar_lea.vmem %s1170_s19, 512  ;;  %p854_p3 = scmp.lt.s32.totalorder %s1170_s19, %s1170_s19 }
  0x61   : > { %p847_p6 = scmp.ne.s32.totalorder %s1170_s19, %s846_s14  ;;  %p855_p1 = scmp.lt.s32.totalorder %s846_s14, %s846_s14 }
  0x63   : > { %p849_p2 = pnand %p847_p6, %p835_p4  ;;  %p856_p5 = por %p855_p1, %p854_p3 }
  0x65   : > { %p850_p0 = pneg %p849_p2 }
  0x67   : > { %p857_p11 = pnand %p856_p5, %p850_p0 }
  0x69   : > { %860 = shalt.err (!%p857_p11)
}
  0x6a   : > { %s1000_s3 = smov 128   ;;  %s1001_s15 = smov 8  }
  0x6b   : > { %711 = dma.hbm_to_vmem [thread:$0]  (!%p1409_p10), %s1385_s1, 512, %s1170_s19, [#allocation6], %s1000_s3, %s1000_s3, %s1001_s15  }
  0x6c   : > { %p1410_p8 = scmp.ne.s32.totalorder %s1406_s17, 0 }
  0x6d   : > { %s1397_s8 = sand.u32 (!%p1410_p8), 1, %s1128_s10   ;;  %s1223_s20 = sand.u32 (!%p1410_p8), 1, %s987_s22  }
  0x6e   : > { %271 = sbr.rel (%p1410_p8) target bundleno = 426 (0x1aa), region = 36  ;;  %s1226_s18 = sshll.u32 (!%p1410_p8), %s1223_s20, 3 }
  0x6f   : > { %s274_s9 = scalar_lea.sflag (!%p1410_p8), [#allocation3], %s1397_s8  ;;  %s277_s26 = scalar_lea.vmem (!%p1410_p8), [#allocation2], %s1226_s18 }
  0x70   : > { %p1411_p4 = scmp.ne.s32.totalorder (!%p1410_p8), %s1403_s16, 0 }
  0x75   : > { %962 = dma.done.wait (%p1411_p4), %s274_s9, 128  }
  0x76   : > { %964 = vsyncadd (%p1411_p4), %s274_s9, 4294967168  ;;  %p1412_p10 = scmp.eq.s32.totalorder %s1128_s10, 0 }
  0x78   : > { %966 = dma.done.wait (%p1412_p10), [#allocation6], 512   ;;  %p1413_p7 = pmov %p1412_p10 }
  0x79   : > { %s290_s17 = scalar_lea.vmem [#allocation7], %s1226_s18 }
  0x7a   : > { %968 = vsyncadd (%p1413_p7), [#allocation6], 4294966784 }
  0x7b   : > { %970 = dma.done.wait (%p1411_p4), %s274_s9, 128  }
  0x7c   : > { %972 = vsyncadd (%p1411_p4), %s274_s9, 4294967168  ;;  %v1002_v0 = vmov 0.0|0.0   ;;  %vm1003_vm0 = vmmov 0   ;;  %v1004_v1 = vmov 0.0   ;;  %v335_v2 = vld [vmem:[#allocation5] sm:$0xff]  ;;  %v336_v3 = vld [vmem:[#allocation5 + $0x8] sm:$0xff] }
  0x7d   : > { %688 = vmatprep.subr.bf16.mxu0 %v1002_v0  ;;  %685 = vmatprep.mubr.msk.f32.mxu0 %vm1003_vm0, %v1004_v1  ;;  %v337_v4 = vld [vmem:[#allocation5 + $0x10] sm:$0xff]  ;;  %v689_v5 = vpack.c.bf16 %v336_v3, %v335_v2  ;;  %v338_v6 = vld [vmem:[#allocation5 + $0x18] sm:$0xff]  ;;  %vm346_vm1 = vcmask 261120   ;;  %s660_s7 = sshll.u32 %s1223_s20, 1  ;;  %s667_s29 = sshll.u32 %s1128_s10, 7  ;;  %v432_v16 = vld [vmem:[%s290_s17] sm:$0xff] }
  0x7e   : > { %v692_v7 = vpack.c.bf16 %v338_v6, %v337_v4  ;;  %v334_v8 = vld [vmem:[%s277_s26] sm:$0xff]  ;;  %s319_s0 = scalar_lea.vmem [#allocation8], %s1226_s18  ;;  %s1257_s15 = scalar_lea.hbm %s1388_s4, %s667_s29 }
  0x7f   : > { %690 = vmatpush3.bf16.msra.mxu0 %v689_v5  ;;  %v662_v9 = vld [vmem:[%s1386_s2] ss:$0 sm:$0xff]  ;;  %s460_s12 = sshll.u32 %s319_s0, 4  ;;  %s668_s27 = sshll.u32 %s1128_s10, 5  ;;  %s1259_s12 = int_to_ptr.vmem [resolvable:$true] %s460_s12 }
  0x80   : > { %691 = vmatprep.subr.bf16.mxu0 %v1002_v0  ;;  %s1262_s30 = scalar_lea.vmem [#allocation9], %s660_s7  ;;  %s1398_s26 = scalar_lea.vmem [#allocation11], %s1226_s18 }
  0x81   : > { %s473_s9 = sshll.u32 %s1262_s30, 4  ;;  %s1268_s17 = sshll.u32 %s1398_s26, 4  ;;  %s1301_s9 = int_to_ptr.vmem [resolvable:$true] %s473_s9  ;;  %s1311_s17 = int_to_ptr.vmem [resolvable:$true] %s1268_s17 }
  0x82   : > { %s437_s16 = scalar_lea.sflag [#allocation4], %s1223_s20  ;;  %s861_s19 = scalar_lea.vmem %s1259_s12, 128 }
  0x83   : > { %693 = vmatpush3.bf16.msra.mxu0 %v692_v7  ;;  %p862_p9 = scmp.ne.s32.totalorder %s1259_s12, %s861_s19  ;;  %p1414_p12 = scmp.ne.s32.totalorder %s1404_s11, 0 }
  0x84   : > { %s1005_s14 = smov [#allocation8]  }
  0x85   : > { %p863_p13 = pnand %p862_p9, %p1414_p12  ;;  %s865_s3 = sshll.u32 %s1005_s14, 4  ;;  %s866_s3 = int_to_ptr.vmem [resolvable:$false] %s865_s3 }
  0x86   : > { %686 = vmatmul.mubr.msk.f32.vlgmr.msra.gmra.mrb[0].mxu0 %vm346_vm1, %v334_v8  ;;  %s867_s7 = scalar_lea.vmem %s866_s3, 256  ;;  %p868_p2 = scmp.lt.s32.totalorder %s1259_s12, %s866_s3 }
  0x87   : > { %p864_p6 = pneg %p863_p13  ;;  %p869_p0 = scmp.lt.s32.totalorder %s867_s7, %s861_s19 }
  0x89   : > { %p870_p3 = por %p869_p0, %p868_p2 }
  0x8b   : > { %p871_p1 = pnand %p870_p3, %p864_p6 }
 0x159   : > { %v416_v10 = vpop.f32.mrb[0].mxu0 }
 0x15a   : > { %v417_v11 = vadd.f32 %v662_v9, %v416_v10  ;;  %v687_v12 = vpop.f32.mrb[1].mxu0 }
 0x15c   : > { %v420_v13 = vmul.f32 0.5, %v417_v11 }
 0x15e   : > { %771 = vtanh.f32 %v420_v13 }
 0x168   : > { %v772_v14 = vpop.eup %771 }
 0x169   : > { %v422_v15 = vmul.f32 0.5, %v772_v14 }
 0x16b   : > { %v423_v17 = vadd.f32 0.5, %v422_v15 }
 0x16d   : > { %v425_v18 = vpack.c.f32.eXmY %v423_v17, %v423_v17, 312  ;;  %v433_v19 = vsub.f32 %v423_v17, %v432_v16  ;;  %424 = vst [vmem:[%s319_s0] sm:$0xff] %v423_v17 }
 0x16e   : > { %874 = shalt.err (!%p871_p1)
}
 0x16f   : > { %s875_s20 = scalar_lea.hbm %s1257_s15, 128  ;;  %s879_s14 = scalar_lea.hbm %s1388_s4, 256 }
 0x170   : > { %p876_p5 = scmp.ne.s32.totalorder %s1257_s15, %s875_s20  ;;  %p880_p4 = scmp.lt.u32.totalorder %s1257_s15, %s1388_s4 }
 0x171   : > { %p881_p10 = scmp.lt.u32.totalorder %s879_s14, %s875_s20  ;;  %p883_p9 = scmp.lt.u32.totalorder %s875_s20, %s1257_s15 }
 0x172   : > { %p877_p11 = pnand %p876_p5, %p1414_p12 }
 0x173   : > { %p882_p7 = por %p881_p10, %p880_p4 }
 0x174   : > { %p878_p8 = pneg %p877_p11 }
 0x175   : > { %p884_p13 = por %p883_p9, %p882_p7 }
 0x177   : > { %p885_p6 = pnand %p884_p13, %p878_p8 }
 0x179   : > { %888 = shalt.err (!%p885_p6)
}
 0x17a   : > { %702 = dma.vmem_to_hbm [thread:$0]  (%p1414_p12), %s1259_s12, 128, %s1257_s15, %s437_s16   ;;  %v429_v20 = vpack.c.b8 %v425_v18, %v425_v18  ;;  %v434_v21 = vmul.f32 %v433_v19, %v433_v19 }
 0x17b   : > { %s1297_s19 = scalar_lea.hbm %s1389_s5, %s668_s27  ;;  %s1308_s0 = scalar_lea.hbm %s1390_s6, %s667_s29 }
 0x17c   : > { %431 = vst [vmem:[%s1262_s30] sm:$0x3] %v429_v20  ;;  %s1415_s12 = scalar_lea.vmem [#allocation11], %s1226_s18  ;;  %s1416_s15 = sand.u32 1, %s1128_s10  }
 0x17d   : > { %435 = vst [vmem:[%s1415_s12] sm:$0xff] %v434_v21  ;;  %s1318_s27 = scalar_lea.sflag [#allocation10], %s1416_s15  ;;  %s889_s16 = scalar_lea.vmem %s1301_s9, 32 }
 0x17e   : > { %p890_p2 = scmp.ne.s32.totalorder %s1301_s9, %s889_s16  ;;  %s1006_s14 = smov [#allocation9]  }
 0x17f   : > { %s893_s3 = sshll.u32 %s1006_s14, 4  ;;  %s894_s3 = int_to_ptr.vmem [resolvable:$false] %s893_s3 }
 0x180   : > { %p891_p0 = pnand %p890_p2, %p1414_p12  ;;  %s895_s8 = scalar_lea.vmem %s894_s3, 64 }
 0x181   : > { %p896_p1 = scmp.lt.s32.totalorder %s1301_s9, %s894_s3  ;;  %p897_p5 = scmp.lt.s32.totalorder %s895_s8, %s889_s16 }
 0x182   : > { %p892_p3 = pneg %p891_p0 }
 0x183   : > { %p898_p11 = por %p897_p5, %p896_p1 }
 0x185   : > { %p899_p8 = pnand %p898_p11, %p892_p3 }
 0x187   : > { %902 = shalt.err (!%p899_p8)
}
 0x188   : > { %s903_s10 = scalar_lea.hbm %s1297_s19, 32  ;;  %s907_s30 = scalar_lea.hbm %s1389_s5, 64 }
 0x189   : > { %p904_p4 = scmp.ne.s32.totalorder %s1297_s19, %s903_s10  ;;  %p908_p9 = scmp.lt.u32.totalorder %s1297_s19, %s1389_s5 }
 0x18a   : > { %p909_p13 = scmp.lt.u32.totalorder %s907_s30, %s903_s10  ;;  %p911_p2 = scmp.lt.u32.totalorder %s903_s10, %s1297_s19 }
 0x18b   : > { %p905_p10 = pnand %p904_p4, %p1414_p12 }
 0x18c   : > { %p910_p6 = por %p909_p13, %p908_p9 }
 0x18d   : > { %p906_p7 = pneg %p905_p10 }
 0x18e   : > { %p912_p0 = por %p911_p2, %p910_p6 }
 0x190   : > { %p913_p3 = pnand %p912_p0, %p906_p7 }
 0x192   : > { %916 = shalt.err (!%p913_p3)
}
 0x193   : > { %703 = dma.vmem_to_hbm [thread:$0]  (%p1414_p12), %s1301_s9, 32, %s1297_s19, %s1318_s27  }
 0x194   : > { %s917_s20 = scalar_lea.vmem %s1311_s17, 128  ;;  %s1007_s12 = smov [#allocation11]  }
 0x195   : > { %p918_p1 = scmp.ne.s32.totalorder %s1311_s17, %s917_s20  ;;  %s921_s15 = sshll.u32 %s1007_s12, 4  ;;  %s922_s15 = int_to_ptr.vmem [resolvable:$false] %s921_s15 }
 0x196   : > { %s923_s16 = scalar_lea.vmem %s922_s15, 256  ;;  %p924_p8 = scmp.lt.s32.totalorder %s1311_s17, %s922_s15 }
 0x197   : > { %p919_p5 = pnand %p918_p1, %p1414_p12  ;;  %p925_p4 = scmp.lt.s32.totalorder %s923_s16, %s917_s20 }
 0x199   : > { %p920_p11 = pneg %p919_p5  ;;  %p926_p10 = por %p925_p4, %p924_p8 }
 0x19b   : > { %p927_p7 = pnand %p926_p10, %p920_p11 }
 0x19d   : > { %930 = shalt.err (!%p927_p7)
}
 0x19e   : > { %s931_s9 = scalar_lea.hbm %s1308_s0, 128  ;;  %s935_s3 = scalar_lea.hbm %s1390_s6, 256 }
 0x19f   : > { %p932_p9 = scmp.ne.s32.totalorder %s1308_s0, %s931_s9  ;;  %p936_p2 = scmp.lt.u32.totalorder %s1308_s0, %s1390_s6 }
 0x1a0   : > { %p937_p0 = scmp.lt.u32.totalorder %s935_s3, %s931_s9  ;;  %p939_p1 = scmp.lt.u32.totalorder %s931_s9, %s1308_s0 }
 0x1a1   : > { %p933_p13 = pnand %p932_p9, %p1414_p12 }
 0x1a2   : > { %p938_p3 = por %p937_p0, %p936_p2 }
 0x1a3   : > { %p934_p6 = pneg %p933_p13 }
 0x1a4   : > { %p940_p5 = por %p939_p1, %p938_p3 }
 0x1a6   : > { %p941_p11 = pnand %p940_p5, %p934_p6 }
 0x1a8   : > { %944 = shalt.err (!%p941_p11)
}
 0x1a9   : > { %704 = dma.vmem_to_hbm [thread:$0]  (%p1414_p12), %s1311_s17, 128, %s1308_s0, %s1318_s27  }
 0x1aa PF: > { %s498_s18 = sand.u32 1, %s983_s21   ;;  %p1417_p8 = scmp.ne.s32.totalorder %s1405_s13, 0 }
 0x1ab   : > { %p1418_p4 = scmp.ge.s32.totalorder %s995_s24, 2  ;;  %s499_s29 = scalar_lea.sflag [#allocation4], %s498_s18 }
 0x1ad   : > { %p720_p10 = pnand %p1418_p4, %p1417_p8 }
 0x1af   : > { %974 = dma.done.wait (!%p720_p10), %s499_s29, 128  }
 0x1b0   : > { %976 = vsyncadd (!%p720_p10), %s499_s29, 4294967168  ;;  %s1419_s30 = sadd.s32 4294967294, %s995_s24  }
 0x1b1   : > { %s507_s26 = sand.u32 1, %s1419_s30  }
 0x1b2   : > { %s508_s7 = scalar_lea.sflag [#allocation10], %s507_s26 }
 0x1b3   : > { %978 = dma.done.wait (!%p720_p10), %s508_s7, 160  }
 0x1b4   : > { %980 = vsyncadd (!%p720_p10), %s508_s7, 4294967136  ;;  %p24_p12 = scmp.ge.s32.totalorder %s1064_s25, 4   ;;  %s1420_s21 = smov %s987_s22 }
 0x1b5   : > { %s1421_s22 = smov %s991_s23  ;;  %s1422_s23 = smov %s1075_s28 }
 0x1b6   : > { %s1423_s24 = smov %s1064_s25  ;;  %26 = sbr.rel (!%p24_p12) target bundleno = 11 (0xb), region = 128 }
 0x1bd   :  { %522 = vsyncpa [#allocation3], 1 }
 0x1be   :  { %524 = vsyncpa [#allocation3 + $0x1], 1 }
 0x1bf   :  { %525 = vsyncpa [#allocation6], 1 }
 0x1c0   :  { %526 = vsyncpa [#allocation4], 1 }
 0x1c1   :  { %528 = vsyncpa [#allocation4 + $0x1], 1 }
 0x1c2   :  { %529 = vsyncpa [#allocation10], 1 }
 0x1c3   :  { %531 = vsyncpa [#allocation10 + $0x1], 1 }

// kernel: tpu_custom_call.1
= control target key start
LH: loop header
LB: loop body
LE: loop exit
PB: predicated region body
PF: predicated region fallthrough
CT: control target
= control target key end

     0   :  { %s1384_s0 = inlined_call_operand.hbm [shape: f32[16,32], index: 0, kind: input, shape index: {}]   ;;  %s1385_s1 = inlined_call_operand.hbm [shape: f32[32,128], index: 1, kind: input, shape index: {}]   ;;  %s1386_s2 = inlined_call_operand.vmem [shape: f32[1,128], index: 2, kind: input, shape index: {}]   ;;  %s1387_s3 = inlined_call_operand.hbm [shape: f32[16,128], index: 3, kind: input, shape index: {}]   ;;  %s1388_s4 = inlined_call_operand.hbm [shape: f32[16,128], index: 4, kind: output, shape index: {0}]   ;;  %s1389_s5 = inlined_call_operand.hbm [shape: s8[16,128], index: 5, kind: output, shape index: {1}]   ;;  %s1390_s6 = inlined_call_operand.hbm [shape: f32[16,128], index: 6, kind: output, shape index: {2}]  }
   0x1   :  { %1399 = sst [smem:[#allocation17_spill]] %s1384_s0 }
   0x2   :  { %1400 = sst [smem:[#allocation18_spill]] %s1387_s3 }
   0x3   :  { %12 = vsyncpa [#allocation3], 0 }
   0x4   :  { %14 = vsyncpa [#allocation3 + $0x1], 0 }
   0x5   :  { %15 = vsyncpa [#allocation6], 0 }
   0x6   :  { %16 = vsyncpa [#allocation4], 0 }
   0x7   :  { %18 = vsyncpa [#allocation4 + $0x1], 0 }
   0x8   :  { %19 = vsyncpa [#allocation10], 0 }
   0x9   :  { %21 = vsyncpa [#allocation10 + $0x1], 0  ;;  %s1043_s21 = smov 0   ;;  %s1045_s22 = smov 0  }
   0xa   :  { %s1047_s23 = smov 0   ;;  %s1049_s24 = smov 0  }
   0xb LB: > { %s1064_s25 = sadd.s32 1, %s995_s24   ;;  %s34_s26 = sadd.s32 1, %s991_s23  ;;  %s995_s24 = sphi %s1049_s24, %s1423_s24   ;;  %s991_s23 = sphi %s1047_s23, %s1422_s23   ;;  %s987_s22 = sphi %s1045_s22, %s1421_s22   ;;  %s983_s21 = sphi %s1043_s21, %s1420_s21  }
   0xc   : > { %s31_s27 = ssub.s32 %s995_s24, %s1064_s25  ;;  %p41_p0 = scmp.ne.s32.totalorder %s991_s23, %s987_s22 }
   0xd   : > { %p32_p1 = scmp.eq.s32.totalorder %s31_s27, 0  ;;  %p42_p2 = scmp.eq.s32.totalorder %s995_s24, 0 }
   0xe   : > { %p730_p4 = scmp.lt.s32.totalorder %s995_s24, 2  ;;  %s233_s29 = sand.u32 1, %s995_s24  }
   0xf   : > { %s1075_s28 = scalar_select %p32_p1, %s991_s23, %s34_s26  }
  0x10   : > { %p43_p5 = por %p42_p2, %p41_p0  ;;  %s235_s30 = sand.u32 1, %s991_s23  }
  0x11   : > { %s1082_s7 = sshll.u32 %s235_s30, 3  ;;  %s652_s8 = sshll.u32 %s995_s24, 7 }
  0x12   : > { %s1401_s0 = sld [smem:[#allocation17_spill]]  ;;  %s237_s12 = scalar_lea.vmem [#allocation2], %s1082_s7 }
  0x13   : > { %s244_s13 = sshll.u32 %s237_s12, 4  ;;  %p1093_p6 = pnand %p730_p4, %p43_p5  ;;  %s1097_s13 = int_to_ptr.vmem [resolvable:$true] %s244_s13 }
  0x14   : > { %s1099_s15 = scalar_lea.sflag [#allocation3], %s233_s29 }
  0x15   : > { %p775_p8 = pneg %p1093_p6 }
  0x18   : > { %s1090_s11 = scalar_lea.hbm %s1401_s0, %s652_s8  ;;  %s778_s19 = scalar_lea.hbm %s1401_s0, 256 }
  0x19   : > { %s773_s16 = scalar_lea.hbm %s1090_s11, 128  ;;  %p779_p11 = scmp.lt.u32.totalorder %s1090_s11, %s1401_s0 }
  0x1a   : > { %p774_p7 = scmp.ne.s32.totalorder %s1090_s11, %s773_s16  ;;  %p780_p12 = scmp.lt.u32.totalorder %s778_s19, %s773_s16 }
  0x1b   : > { %p782_p1 = scmp.lt.u32.totalorder %s773_s16, %s1090_s11 }
  0x1c   : > { %p776_p9 = pnand %p775_p8, %p774_p7  ;;  %p781_p13 = por %p780_p12, %p779_p11 }
  0x1e   : > { %p777_p10 = pneg %p776_p9  ;;  %p783_p2 = por %p782_p1, %p781_p13 }
  0x20   : > { %p784_p4 = pnand %p783_p2, %p777_p10 }
  0x22   : > { %787 = shalt.err (!%p784_p4)
}
  0x23   : > { %s788_s27 = scalar_lea.vmem %s1097_s13, 128  ;;  %s997_s29 = smov [#allocation2]  }
  0x24   : > { %p789_p5 = scmp.ne.s32.totalorder %s1097_s13, %s788_s27  ;;  %s793_s30 = sshll.u32 %s997_s29, 4  ;;  %s794_s30 = int_to_ptr.vmem [resolvable:$false] %s793_s30 }
  0x25   : > { %s795_s9 = scalar_lea.vmem %s794_s30, 256  ;;  %p796_p3 = scmp.lt.s32.totalorder %s1097_s13, %s794_s30 }
  0x26   : > { %p791_p7 = pnand %p789_p5, %p775_p8  ;;  %p797_p11 = scmp.lt.s32.totalorder %s795_s9, %s788_s27 }
  0x28   : > { %p792_p9 = pneg %p791_p7  ;;  %p798_p12 = por %p797_p11, %p796_p3 }
  0x2a   : > { %p799_p13 = pnand %p798_p12, %p792_p9 }
  0x2c   : > { %802 = shalt.err (!%p799_p13)
}
  0x2d   : > { %715 = dma.hbm_to_vmem [thread:$0]  (!%p1093_p6), %s1090_s11, 128, %s1097_s13, %s1099_s15  }
  0x2e   : > { %s1128_s10 = sadd.s32 4294967295, %s995_s24   ;;  %s1393_s12 = sadd.s32 4294967294, %s995_s24  }
  0x2f   : > { %p47_p3 = scmp.ne.s32.totalorder %s987_s22, %s983_s21  ;;  %p1391_p10 = scmp.eq.s32.totalorder %s1128_s10, 0 }
  0x30   : > { %p139_p1 = scmp.eq.s32.totalorder %s1128_s10, 1  ;;  %p145_p2 = scmp.eq.s32.totalorder %s1393_s12, 1 }
  0x31   : > { %p1139_p4 = por %p1391_p10, %p47_p3  ;;  %p648_p5 = scmp.ge.s32.totalorder %s995_s24, 1 }
  0x32   : > { %p1147_p7 = por %p139_p1, %p41_p0  ;;  %p1151_p9 = por %p145_p2, %p47_p3 }
  0x33   : > { %s1403_s16 = scalar_select %p1139_p4, 1, 0 }
  0x34   : > { %s1404_s11 = scalar_select %p1147_p7, 1, 0 }
  0x35   : > { %s1405_s13 = scalar_select %p1151_p9, 1, 0 }
  0x36   : > { %p204_p11 = scmp.lt.s32.totalorder %s995_s24, 3  ;;  %s998_s18 = smov [#allocation5]  }
  0x37   : > { %s216_s19 = sshll.u32 %s998_s18, 4  ;;  %s1407_s3 = sld [smem:[#allocation18_spill]]  ;;  %s1170_s19 = int_to_ptr.vmem [resolvable:$true] %s216_s19 }
  0x38   : > { %p1156_p12 = pnand %p648_p5, %p204_p11  ;;  %s255_s29 = scalar_lea.vmem [#allocation7], %s1082_s7 }
  0x39   : > { %s262_s30 = sshll.u32 %s255_s29, 4  ;;  %s263_s30 = int_to_ptr.vmem [resolvable:$true] %s262_s30 }
  0x3a   : > { %s1406_s17 = scalar_select %p1156_p12, 1, 0 }
  0x3b   : > { %p708_p0 = pneg %p1156_p12 }
  0x3d   : > { %s1165_s27 = scalar_lea.hbm %s1407_s3, %s652_s8  ;;  %p1174_p13 = pnand %p708_p0, %p1391_p10 }
  0x3e   : > { %s803_s18 = scalar_lea.hbm %s1165_s27, 128  ;;  %s808_s26 = scalar_lea.hbm %s1407_s3, 256 }
  0x3f   : > { %s1408_s9 = scalar_select %p1174_p13, 1, 0 }
  0x40   : > { %p804_p3 = scmp.ne.s32.totalorder %s1165_s27, %s803_s18  ;;  %p809_p5 = scmp.lt.u32.totalorder %s1165_s27, %s1407_s3 }
  0x41   : > { %p810_p11 = scmp.lt.u32.totalorder %s808_s26, %s803_s18  ;;  %p812_p0 = scmp.lt.u32.totalorder %s803_s18, %s1165_s27 }
  0x42   : > { %p806_p1 = pnand %p804_p3, %p775_p8 }
  0x43   : > { %p811_p9 = por %p810_p11, %p809_p5 }
  0x44   : > { %p807_p2 = pneg %p806_p1 }
  0x45   : > { %p813_p10 = por %p812_p0, %p811_p9 }
  0x47   : > { %p814_p7 = pnand %p813_p10, %p807_p2 }
  0x49   : > { %817 = shalt.err (!%p814_p7)
}
  0x4a   : > { %s818_s12 = scalar_lea.vmem %s263_s30, 128  ;;  %s999_s0 = smov [#allocation7]  }
  0x4b   : > { %p819_p4 = scmp.ne.s32.totalorder %s263_s30, %s818_s12  ;;  %s823_s8 = sshll.u32 %s999_s0, 4  ;;  %s824_s8 = int_to_ptr.vmem [resolvable:$false] %s823_s8 }
  0x4c   : > { %s825_s20 = scalar_lea.vmem %s824_s8, 256  ;;  %p826_p12 = scmp.lt.s32.totalorder %s263_s30, %s824_s8 }
  0x4d   : > { %p821_p3 = pnand %p819_p4, %p775_p8  ;;  %p827_p13 = scmp.lt.s32.totalorder %s825_s20, %s818_s12 }
  0x4f   : > { %p822_p1 = pneg %p821_p3  ;;  %p828_p5 = por %p827_p13, %p826_p12 }
  0x51   : > { %p829_p11 = pnand %p828_p5, %p822_p1 }
  0x53   : > { %832 = shalt.err (!%p829_p11)
}
  0x54   : > { %718 = dma.hbm_to_vmem [thread:$0]  (!%p1093_p6), %s1165_s27, 128, %s263_s30, %s1099_s15  }
  0x55   : > { %s833_s7 = scalar_lea.hbm %s1385_s1, 512  ;;  %p1409_p10 = scmp.ne.s32.totalorder %s1408_s9, 0 }
  0x56   : > { %p834_p8 = scmp.ne.s32.totalorder %s1385_s1, %s833_s7  ;;  %p840_p12 = scmp.lt.u32.totalorder %s833_s7, %s1385_s1 }
  0x57   : > { %p835_p4 = pneg %p1409_p10 }
  0x59   : > { %p836_p7 = pnand %p835_p4, %p834_p8 }
  0x5b   : > { %p837_p9 = pneg %p836_p7 }
  0x5d   : > { %p842_p13 = pnand %p840_p12, %p837_p9 }
  0x5f   : > { %845 = shalt.err (!%p842_p13)
}
  0x60   : > { %s846_s14 = scalar_lea.vmem %s1170_s19, 512  ;;  %p854_p3 = scmp.lt.s32.totalorder %s1170_s19, %s1170_s19 }
  0x61   : > { %p847_p6 = scmp.ne.s32.totalorder %s1170_s19, %s846_s14  ;;  %p855_p1 = scmp.lt.s32.totalorder %s846_s14, %s846_s14 }
  0x63   : > { %p849_p2 = pnand %p847_p6, %p835_p4  ;;  %p856_p5 = por %p855_p1, %p854_p3 }
  0x65   : > { %p850_p0 = pneg %p849_p2 }
  0x67   : > { %p857_p11 = pnand %p856_p5, %p850_p0 }
  0x69   : > { %860 = shalt.err (!%p857_p11)
}
  0x6a   : > { %s1000_s3 = smov 128   ;;  %s1001_s15 = smov 8  }
  0x6b   : > { %711 = dma.hbm_to_vmem [thread:$0]  (!%p1409_p10), %s1385_s1, 512, %s1170_s19, [#allocation6], %s1000_s3, %s1000_s3, %s1001_s15  }
  0x6c   : > { %p1410_p8 = scmp.ne.s32.totalorder %s1406_s17, 0 }
  0x6d   : > { %s1397_s8 = sand.u32 (!%p1410_p8), 1, %s1128_s10   ;;  %s1223_s20 = sand.u32 (!%p1410_p8), 1, %s987_s22  }
  0x6e   : > { %271 = sbr.rel (%p1410_p8) target bundleno = 426 (0x1aa), region = 36  ;;  %s1226_s18 = sshll.u32 (!%p1410_p8), %s1223_s20, 3 }
  0x6f   : > { %s274_s9 = scalar_lea.sflag (!%p1410_p8), [#allocation3], %s1397_s8  ;;  %s277_s26 = scalar_lea.vmem (!%p1410_p8), [#allocation2], %s1226_s18 }
  0x70   : > { %p1411_p4 = scmp.ne.s32.totalorder (!%p1410_p8), %s1403_s16, 0 }
  0x75   : > { %962 = dma.done.wait (%p1411_p4), %s274_s9, 128  }
  0x76   : > { %964 = vsyncadd (%p1411_p4), %s274_s9, 4294967168  ;;  %p1412_p10 = scmp.eq.s32.totalorder %s1128_s10, 0 }
  0x78   : > { %966 = dma.done.wait (%p1412_p10), [#allocation6], 512   ;;  %p1413_p7 = pmov %p1412_p10 }
  0x79   : > { %s290_s17 = scalar_lea.vmem [#allocation7], %s1226_s18 }
  0x7a   : > { %968 = vsyncadd (%p1413_p7), [#allocation6], 4294966784 }
  0x7b   : > { %970 = dma.done.wait (%p1411_p4), %s274_s9, 128  }
  0x7c   : > { %972 = vsyncadd (%p1411_p4), %s274_s9, 4294967168  ;;  %v1002_v0 = vmov 0.0|0.0   ;;  %vm1003_vm0 = vmmov 0   ;;  %v1004_v1 = vmov 0.0   ;;  %v335_v2 = vld [vmem:[#allocation5] sm:$0xff]  ;;  %v336_v3 = vld [vmem:[#allocation5 + $0x8] sm:$0xff] }
  0x7d   : > { %688 = vmatprep.subr.bf16.mxu0 %v1002_v0  ;;  %685 = vmatprep.mubr.msk.f32.mxu0 %vm1003_vm0, %v1004_v1  ;;  %v337_v4 = vld [vmem:[#allocation5 + $0x10] sm:$0xff]  ;;  %v689_v5 = vpack.c.bf16 %v336_v3, %v335_v2  ;;  %v338_v6 = vld [vmem:[#allocation5 + $0x18] sm:$0xff]  ;;  %vm346_vm1 = vcmask 261120   ;;  %s660_s7 = sshll.u32 %s1223_s20, 1  ;;  %s667_s29 = sshll.u32 %s1128_s10, 7  ;;  %v432_v16 = vld [vmem:[%s290_s17] sm:$0xff] }
  0x7e   : > { %v692_v7 = vpack.c.bf16 %v338_v6, %v337_v4  ;;  %v334_v8 = vld [vmem:[%s277_s26] sm:$0xff]  ;;  %s319_s0 = scalar_lea.vmem [#allocation8], %s1226_s18  ;;  %s1257_s15 = scalar_lea.hbm %s1388_s4, %s667_s29 }
  0x7f   : > { %690 = vmatpush3.bf16.msra.mxu0 %v689_v5  ;;  %v662_v9 = vld [vmem:[%s1386_s2] ss:$0 sm:$0xff]  ;;  %s460_s12 = sshll.u32 %s319_s0, 4  ;;  %s668_s27 = sshll.u32 %s1128_s10, 5  ;;  %s1259_s12 = int_to_ptr.vmem [resolvable:$true] %s460_s12 }
  0x80   : > { %691 = vmatprep.subr.bf16.mxu0 %v1002_v0  ;;  %s1262_s30 = scalar_lea.vmem [#allocation9], %s660_s7  ;;  %s1398_s26 = scalar_lea.vmem [#allocation11], %s1226_s18 }
  0x81   : > { %s473_s9 = sshll.u32 %s1262_s30, 4  ;;  %s1268_s17 = sshll.u32 %s1398_s26, 4  ;;  %s1301_s9 = int_to_ptr.vmem [resolvable:$true] %s473_s9  ;;  %s1311_s17 = int_to_ptr.vmem [resolvable:$true] %s1268_s17 }
  0x82   : > { %s437_s16 = scalar_lea.sflag [#allocation4], %s1223_s20  ;;  %s861_s19 = scalar_lea.vmem %s1259_s12, 128 }
  0x83   : > { %693 = vmatpush3.bf16.msra.mxu0 %v692_v7  ;;  %p862_p9 = scmp.ne.s32.totalorder %s1259_s12, %s861_s19  ;;  %p1414_p12 = scmp.ne.s32.totalorder %s1404_s11, 0 }
  0x84   : > { %s1005_s14 = smov [#allocation8]  }
  0x85   : > { %p863_p13 = pnand %p862_p9, %p1414_p12  ;;  %s865_s3 = sshll.u32 %s1005_s14, 4  ;;  %s866_s3 = int_to_ptr.vmem [resolvable:$false] %s865_s3 }
  0x86   : > { %686 = vmatmul.mubr.msk.f32.vlgmr.msra.gmra.mrb[0].mxu0 %vm346_vm1, %v334_v8  ;;  %s867_s7 = scalar_lea.vmem %s866_s3, 256  ;;  %p868_p2 = scmp.lt.s32.totalorder %s1259_s12, %s866_s3 }
  0x87   : > { %p864_p6 = pneg %p863_p13  ;;  %p869_p0 = scmp.lt.s32.totalorder %s867_s7, %s861_s19 }
  0x89   : > { %p870_p3 = por %p869_p0, %p868_p2 }
  0x8b   : > { %p871_p1 = pnand %p870_p3, %p864_p6 }
 0x159   : > { %v416_v10 = vpop.f32.mrb[0].mxu0 }
 0x15a   : > { %v417_v11 = vadd.f32 %v662_v9, %v416_v10  ;;  %v687_v12 = vpop.f32.mrb[1].mxu0 }
 0x15c   : > { %v420_v13 = vmul.f32 0.5, %v417_v11 }
 0x15e   : > { %771 = vtanh.f32 %v420_v13 }
 0x168   : > { %v772_v14 = vpop.eup %771 }
 0x169   : > { %v422_v15 = vmul.f32 0.5, %v772_v14 }
 0x16b   : > { %v423_v17 = vadd.f32 0.5, %v422_v15 }
 0x16d   : > { %v425_v18 = vpack.c.f32.eXmY %v423_v17, %v423_v17, 312  ;;  %v433_v19 = vsub.f32 %v423_v17, %v432_v16  ;;  %424 = vst [vmem:[%s319_s0] sm:$0xff] %v423_v17 }
 0x16e   : > { %874 = shalt.err (!%p871_p1)
}
 0x16f   : > { %s875_s20 = scalar_lea.hbm %s1257_s15, 128  ;;  %s879_s14 = scalar_lea.hbm %s1388_s4, 256 }
 0x170   : > { %p876_p5 = scmp.ne.s32.totalorder %s1257_s15, %s875_s20  ;;  %p880_p4 = scmp.lt.u32.totalorder %s1257_s15, %s1388_s4 }
 0x171   : > { %p881_p10 = scmp.lt.u32.totalorder %s879_s14, %s875_s20  ;;  %p883_p9 = scmp.lt.u32.totalorder %s875_s20, %s1257_s15 }
 0x172   : > { %p877_p11 = pnand %p876_p5, %p1414_p12 }
 0x173   : > { %p882_p7 = por %p881_p10, %p880_p4 }
 0x174   : > { %p878_p8 = pneg %p877_p11 }
 0x175   : > { %p884_p13 = por %p883_p9, %p882_p7 }
 0x177   : > { %p885_p6 = pnand %p884_p13, %p878_p8 }
 0x179   : > { %888 = shalt.err (!%p885_p6)
}
 0x17a   : > { %702 = dma.vmem_to_hbm [thread:$0]  (%p1414_p12), %s1259_s12, 128, %s1257_s15, %s437_s16   ;;  %v429_v20 = vpack.c.b8 %v425_v18, %v425_v18  ;;  %v434_v21 = vmul.f32 %v433_v19, %v433_v19 }
 0x17b   : > { %s1297_s19 = scalar_lea.hbm %s1389_s5, %s668_s27  ;;  %s1308_s0 = scalar_lea.hbm %s1390_s6, %s667_s29 }
 0x17c   : > { %431 = vst [vmem:[%s1262_s30] sm:$0x3] %v429_v20  ;;  %s1415_s12 = scalar_lea.vmem [#allocation11], %s1226_s18  ;;  %s1416_s15 = sand.u32 1, %s1128_s10  }
 0x17d   : > { %435 = vst [vmem:[%s1415_s12] sm:$0xff] %v434_v21  ;;  %s1318_s27 = scalar_lea.sflag [#allocation10], %s1416_s15  ;;  %s889_s16 = scalar_lea.vmem %s1301_s9, 32 }
 0x17e   : > { %p890_p2 = scmp.ne.s32.totalorder %s1301_s9, %s889_s16  ;;  %s1006_s14 = smov [#allocation9]  }
 0x17f   : > { %s893_s3 = sshll.u32 %s1006_s14, 4  ;;  %s894_s3 = int_to_ptr.vmem [resolvable:$false] %s893_s3 }
 0x180   : > { %p891_p0 = pnand %p890_p2, %p1414_p12  ;;  %s895_s8 = scalar_lea.vmem %s894_s3, 64 }
 0x181   : > { %p896_p1 = scmp.lt.s32.totalorder %s1301_s9, %s894_s3  ;;  %p897_p5 = scmp.lt.s32.totalorder %s895_s8, %s889_s16 }
 0x182   : > { %p892_p3 = pneg %p891_p0 }
 0x183   : > { %p898_p11 = por %p897_p5, %p896_p1 }
 0x185   : > { %p899_p8 = pnand %p898_p11, %p892_p3 }
 0x187   : > { %902 = shalt.err (!%p899_p8)
}
 0x188   : > { %s903_s10 = scalar_lea.hbm %s1297_s19, 32  ;;  %s907_s30 = scalar_lea.hbm %s1389_s5, 64 }
 0x189   : > { %p904_p4 = scmp.ne.s32.totalorder %s1297_s19, %s903_s10  ;;  %p908_p9 = scmp.lt.u32.totalorder %s1297_s19, %s1389_s5 }
 0x18a   : > { %p909_p13 = scmp.lt.u32.totalorder %s907_s30, %s903_s10  ;;  %p911_p2 = scmp.lt.u32.totalorder %s903_s10, %s1297_s19 }
 0x18b   : > { %p905_p10 = pnand %p904_p4, %p1414_p12 }
 0x18c   : > { %p910_p6 = por %p909_p13, %p908_p9 }
 0x18d   : > { %p906_p7 = pneg %p905_p10 }
 0x18e   : > { %p912_p0 = por %p911_p2, %p910_p6 }
 0x190   : > { %p913_p3 = pnand %p912_p0, %p906_p7 }
 0x192   : > { %916 = shalt.err (!%p913_p3)
}
 0x193   : > { %703 = dma.vmem_to_hbm [thread:$0]  (%p1414_p12), %s1301_s9, 32, %s1297_s19, %s1318_s27  }
 0x194   : > { %s917_s20 = scalar_lea.vmem %s1311_s17, 128  ;;  %s1007_s12 = smov [#allocation11]  }
 0x195   : > { %p918_p1 = scmp.ne.s32.totalorder %s1311_s17, %s917_s20  ;;  %s921_s15 = sshll.u32 %s1007_s12, 4  ;;  %s922_s15 = int_to_ptr.vmem [resolvable:$false] %s921_s15 }
 0x196   : > { %s923_s16 = scalar_lea.vmem %s922_s15, 256  ;;  %p924_p8 = scmp.lt.s32.totalorder %s1311_s17, %s922_s15 }
 0x197   : > { %p919_p5 = pnand %p918_p1, %p1414_p12  ;;  %p925_p4 = scmp.lt.s32.totalorder %s923_s16, %s917_s20 }
 0x199   : > { %p920_p11 = pneg %p919_p5  ;;  %p926_p10 = por %p925_p4, %p924_p8 }
 0x19b   : > { %p927_p7 = pnand %p926_p10, %p920_p11 }
 0x19d   : > { %930 = shalt.err (!%p927_p7)
}
 0x19e   : > { %s931_s9 = scalar_lea.hbm %s1308_s0, 128  ;;  %s935_s3 = scalar_lea.hbm %s1390_s6, 256 }
 0x19f   : > { %p932_p9 = scmp.ne.s32.totalorder %s1308_s0, %s931_s9  ;;  %p936_p2 = scmp.lt.u32.totalorder %s1308_s0, %s1390_s6 }
 0x1a0   : > { %p937_p0 = scmp.lt.u32.totalorder %s935_s3, %s931_s9  ;;  %p939_p1 = scmp.lt.u32.totalorder %s931_s9, %s1308_s0 }
 0x1a1   : > { %p933_p13 = pnand %p932_p9, %p1414_p12 }
 0x1a2   : > { %p938_p3 = por %p937_p0, %p936_p2 }
 0x1a3   : > { %p934_p6 = pneg %p933_p13 }
 0x1a4   : > { %p940_p5 = por %p939_p1, %p938_p3 }
 0x1a6   : > { %p941_p11 = pnand %p940_p5, %p934_p6 }
 0x1a8   : > { %944 = shalt.err (!%p941_p11)
}
 0x1a9   : > { %704 = dma.vmem_to_hbm [thread:$0]  (%p1414_p12), %s1311_s17, 128, %s1308_s0, %s1318_s27  }
 0x1aa PF: > { %s498_s18 = sand.u32 1, %s983_s21   ;;  %p1417_p8 = scmp.ne.s32.totalorder %s1405_s13, 0 }
 0x1ab   : > { %p1418_p4 = scmp.ge.s32.totalorder %s995_s24, 2  ;;  %s499_s29 = scalar_lea.sflag [#allocation4], %s498_s18 }
 0x1ad   : > { %p720_p10 = pnand %p1418_p4, %p1417_p8 }
 0x1af   : > { %974 = dma.done.wait (!%p720_p10), %s499_s29, 128  }
 0x1b0   : > { %976 = vsyncadd (!%p720_p10), %s499_s29, 4294967168  ;;  %s1419_s30 = sadd.s32 4294967294, %s995_s24  }
 0x1b1   : > { %s507_s26 = sand.u32 1, %s1419_s30  }
 0x1b2   : > { %s508_s7 = scalar_lea.sflag [#allocation10], %s507_s26 }
 0x1b3   : > { %978 = dma.done.wait (!%p720_p10), %s508_s7, 160  }
 0x1b4   : > { %980 = vsyncadd (!%p720_p10), %s508_s7, 4294967136  ;;  %p24_p12 = scmp.ge.s32.totalorder %s1064_s25, 4   ;;  %s1420_s21 = smov %s987_s22 }
 0x1b5   : > { %s1421_s22 = smov %s991_s23  ;;  %s1422_s23 = smov %s1075_s28 }
 0x1b6   : > { %s1423_s24 = smov %s1064_s25  ;;  %26 = sbr.rel (!%p24_p12) target bundleno = 11 (0xb), region = 128 }
 0x1bd   :  { %522 = vsyncpa [#allocation3], 1 }
 0x1be   :  { %524 = vsyncpa [#allocation3 + $0x1], 1 }
 0x1bf   :  { %525 = vsyncpa [#allocation6], 1 }
 0x1c0   :  { %526 = vsyncpa [#allocation4], 1 }
 0x1c1   :  { %528 = vsyncpa [#allocation4 + $0x1], 1 }
 0x1c2   :  { %529 = vsyncpa [#allocation10], 1 }
 0x1c3   :  { %531 = vsyncpa [#allocation10 + $0x1], 1 }

</bundles_post_ra>
